<compile_context>
chip_gen: v5e
topology: v5e:2x2
jax: 0.10.0
libtpu: 0.0.40
codegen_flags: <defaults>
</compile_context>

<pallas_src>
import jax
import jax.numpy as jnp
from jax import lax
from jax.experimental import pallas as pl
from jax.experimental.pallas import tpu as pltpu

VOCAB_SIZE = 8      # stands in for len(chars)
KERNEL_SIZE = 3
STRIDES = (2, 2, 2, 1)
RELUS = (True, True, True, False)   # conv4 has no ReLU


def _conv_out_len(L, k, s):
    return (L - k) // s + 1


# ------------------------- host-side weight folding --------------------------
def _effective_weight(w, b, L_in, stride, ksize=KERNEL_SIZE):
    """Fold a strided Conv1d into a dense (C_in*L_in, C_out*L_out) matrix.

    W_eff[c_in*L_in + j, c_out*L_out + t] = sum_k w[c_out, c_in, k] * [j == s*t + k]
    Built with pure elementwise ops so the reindexing is bit-exact.
    """
    C_out, C_in, K = w.shape
    L_out = _conv_out_len(L_in, K, stride)
    j = jnp.arange(L_in)
    t = jnp.arange(L_out)
    k = jnp.arange(K)
    # sel[j, t, k] = 1 iff j == stride*t + k   (at most one k per (j, t))
    sel = (j[:, None, None] == stride * t[None, :, None] + k[None, None, :]
           ).astype(jnp.float32)                                  # (L_in, L_out, K)
    w_perm = jnp.transpose(w, (1, 0, 2)).astype(jnp.float32)      # (C_in, C_out, K)
    # W[i, j, o, t] = sum_k w[o, i, k] * sel[j, t, k]   (elementwise, exact)
    W = jnp.sum(w_perm[:, None, :, None, :] * sel[None, :, None, :, :], axis=-1)
    W = W.reshape(C_in * L_in, C_out * L_out)
    b_row = jnp.broadcast_to(b.astype(jnp.float32)[:, None],
                             (C_out, L_out)).reshape(1, C_out * L_out)
    return W, b_row, L_out


def prepare_decoder_params(params, L_in):
    """One-time prep: 4 dense effective weights + one lane-aligned bias table."""
    ws, b_rows, L = [], [], L_in
    for (w, b), s in zip(params, STRIDES):
        W_eff, b_row, L = _effective_weight(w, b, L, s)
        ws.append(W_eff)
        b_rows.append(b_row)
    # Pack biases into one (num_layers, pad_w) table; row l starts at lane 0.
    max_len = max(r.shape[1] for r in b_rows)
    pad_w = -(-max_len // 128) * 128
    b_all = jnp.concatenate(
        [jnp.pad(r, ((0, 0), (0, pad_w - r.shape[1]))) for r in b_rows], axis=0)
    return tuple(ws), b_all


# ------------------------------ fused kernel --------------------------------
def _decoder_kernel(x_ref,                             # (N, C_in*L0)
                    w1_ref, w2_ref, w3_ref, w4_ref,    # (C_in*L_in, C_out*L_out)
                    b_ref,                             # (4, pad_w) bias table
                    o_ref):                            # (N, C_out*L_final)
    hi = lax.Precision.HIGHEST
    h = x_ref[...]                                     # (N, C*L), N on sublanes
    for l, (w_ref, relu) in enumerate(
            zip((w1_ref, w2_ref, w3_ref, w4_ref), RELUS)):
        n_out = w_ref.shape[1]                         # static: C_out * L_out
        y = jnp.dot(h, w_ref[...],
                    preferred_element_type=jnp.float32, precision=hi)
        y = y + b_ref[l:l + 1, 0:n_out]                # (1, n_out) bcast over N
        h = jnp.maximum(y, 0.0) if relu else y
    o_ref[...] = h.astype(o_ref.dtype)                 # single lane-dense store


# ------------------------------ host wrapper ---------------------------------
def decoder_forward(x_ncl, ws, b_all):
    N, C_in, L0 = x_ncl.shape
    assert C_in == 1
    L = L0
    for s in STRIDES:
        L = _conv_out_len(L, KERNEL_SIZE, s)
    C_out = ws[-1].shape[1] // L
    x2d = x_ncl.reshape(N, C_in * L0)                  # flatten (C_in, L) -> lanes
    out_flat = pl.pallas_call(
        _decoder_kernel,
        out_shape=jax.ShapeDtypeStruct((N, C_out * L), jnp.float32),
        in_specs=[pl.BlockSpec(memory_space=pltpu.MemorySpace.VMEM)] * 6,
        out_specs=pl.BlockSpec(memory_space=pltpu.MemorySpace.VMEM),
    )(x2d, *ws, b_all)
    return out_flat.reshape(N, C_out, L)               # (N, C, L_final)


# --------------------------- params / reference ------------------------------
def init_params(key, vocab_size):
    # Deterministic init mimicking nn.Conv1d default: U(-1/sqrt(fan_in), +...)
    params = []
    specs = [(vocab_size, 1), (vocab_size, vocab_size),
             (vocab_size, vocab_size), (vocab_size, vocab_size)]
    for (c_out, c_in) in specs:
        key, kw, kb = jax.random.split(key, 3)
        fan_in = c_in * KERNEL_SIZE
        bound = 1.0 / (fan_in ** 0.5)
        w = jax.random.uniform(kw, (c_out, c_in, KERNEL_SIZE), jnp.float32,
                               -bound, bound)
        b = jax.random.uniform(kb, (c_out,), jnp.float32, -bound, bound)
        params.append((w, b))
    return params


def decoder_reference(x_ncl, params):
    # Pure-JAX reference (NCL layout, identical semantics to PyTorch forward).
    x = x_ncl
    for (w, b), s, r in zip(params, STRIDES, RELUS):
        y = lax.conv_general_dilated(
            x, w, window_strides=(s,), padding='VALID',
            dimension_numbers=('NCH', 'OIH', 'NCH'),
            precision=lax.Precision.HIGHEST)
        y = y + b[None, :, None]
        x = jnp.maximum(y, 0.0) if r else y
    return x


if __name__ == "__main__":
    key = jax.random.PRNGKey(0)
    key, kx = jax.random.split(key)
    x = jax.random.normal(kx, (2, 1, 64), jnp.float32)   # (N, C_in=1, L)
    params = init_params(key, VOCAB_SIZE)

    ws, b_all = prepare_decoder_params(params, x.shape[-1])
    out = jax.jit(decoder_forward)(x, ws, b_all)
    out = jax.block_until_ready(out)

    ref = decoder_reference(x, params)
    # 64 -> 31 -> 15 -> 7 -> 5 along L
    assert out.shape == ref.shape == (2, VOCAB_SIZE, 5), out.shape
    assert jnp.allclose(out, ref, atol=1e-4, rtol=1e-4)
    print("KERNEL_OK")
</pallas_src>

<mosaic_0001>
module attributes {stable_mosaic.version = 11 : i64} {
  func.func @_decoder_kernel(%arg0: memref<2x64xf32, #tpu.memory_space<vmem>>, %arg1: memref<64x248xf32, #tpu.memory_space<vmem>>, %arg2: memref<248x120xf32, #tpu.memory_space<vmem>>, %arg3: memref<120x56xf32, #tpu.memory_space<vmem>>, %arg4: memref<56x40xf32, #tpu.memory_space<vmem>>, %arg5: memref<4x256xf32, #tpu.memory_space<vmem>>, %arg6: memref<2x40xf32, #tpu.memory_space<vmem>>) attributes {dimension_semantics = [], scalar_prefetch = 0 : i64, scratch_operands = 0 : i64, tpu.core_type = #tpu.core_type<tc>} {
    %c0 = arith.constant 0 : index
    %c0_0 = arith.constant 0 : index
    %0 = vector.load %arg0[%c0, %c0_0] : memref<2x64xf32, #tpu.memory_space<vmem>>, vector<2x64xf32>
    %c0_1 = arith.constant 0 : index
    %c0_2 = arith.constant 0 : index
    %1 = vector.load %arg1[%c0_1, %c0_2] : memref<64x248xf32, #tpu.memory_space<vmem>>, vector<64x248xf32>
    %cst = arith.constant dense<0.000000e+00> : vector<2x248xf32>
    %2 = tpu.matmul %0, %1, %cst {dimension_numbers = #tpu.dot_dimension_numbers<[1], [0], [0], [1], [0, 0, 1, 1], [], []>, precision = #tpu.contract_precision<fp32>} : vector<2x64xf32>, vector<64x248xf32>, vector<2x248xf32> -> vector<2x248xf32>
    %c0_3 = arith.constant 0 : index
    %c0_4 = arith.constant 0 : index
    %3 = vector.load %arg5[%c0_3, %c0_4] : memref<4x256xf32, #tpu.memory_space<vmem>>, vector<1x248xf32>
    %4 = vector.broadcast %3 : vector<1x248xf32> to vector<2x248xf32>
    %5 = arith.addf %2, %4 : vector<2x248xf32>
    %cst_5 = arith.constant 0.000000e+00 : f32
    %6 = vector.broadcast %cst_5 : f32 to vector<2x248xf32>
    %7 = arith.maximumf %5, %6 : vector<2x248xf32>
    %c0_6 = arith.constant 0 : index
    %c0_7 = arith.constant 0 : index
    %8 = vector.load %arg2[%c0_6, %c0_7] : memref<248x120xf32, #tpu.memory_space<vmem>>, vector<248x120xf32>
    %cst_8 = arith.constant dense<0.000000e+00> : vector<2x120xf32>
    %9 = tpu.matmul %7, %8, %cst_8 {dimension_numbers = #tpu.dot_dimension_numbers<[1], [0], [0], [1], [0, 0, 1, 1], [], []>, precision = #tpu.contract_precision<fp32>} : vector<2x248xf32>, vector<248x120xf32>, vector<2x120xf32> -> vector<2x120xf32>
    %c1 = arith.constant 1 : index
    %c0_9 = arith.constant 0 : index
    %10 = vector.load %arg5[%c1, %c0_9] : memref<4x256xf32, #tpu.memory_space<vmem>>, vector<1x120xf32>
    %11 = vector.broadcast %10 : vector<1x120xf32> to vector<2x120xf32>
    %12 = arith.addf %9, %11 : vector<2x120xf32>
    %cst_10 = arith.constant 0.000000e+00 : f32
    %13 = vector.broadcast %cst_10 : f32 to vector<2x120xf32>
    %14 = arith.maximumf %12, %13 : vector<2x120xf32>
    %c0_11 = arith.constant 0 : index
    %c0_12 = arith.constant 0 : index
    %15 = vector.load %arg3[%c0_11, %c0_12] : memref<120x56xf32, #tpu.memory_space<vmem>>, vector<120x56xf32>
    %cst_13 = arith.constant dense<0.000000e+00> : vector<2x56xf32>
    %16 = tpu.matmul %14, %15, %cst_13 {dimension_numbers = #tpu.dot_dimension_numbers<[1], [0], [0], [1], [0, 0, 1, 1], [], []>, precision = #tpu.contract_precision<fp32>} : vector<2x120xf32>, vector<120x56xf32>, vector<2x56xf32> -> vector<2x56xf32>
    %c2 = arith.constant 2 : index
    %c0_14 = arith.constant 0 : index
    %17 = vector.load %arg5[%c2, %c0_14] : memref<4x256xf32, #tpu.memory_space<vmem>>, vector<1x56xf32>
    %18 = vector.broadcast %17 : vector<1x56xf32> to vector<2x56xf32>
    %19 = arith.addf %16, %18 : vector<2x56xf32>
    %cst_15 = arith.constant 0.000000e+00 : f32
    %20 = vector.broadcast %cst_15 : f32 to vector<2x56xf32>
    %21 = arith.maximumf %19, %20 : vector<2x56xf32>
    %c0_16 = arith.constant 0 : index
    %c0_17 = arith.constant 0 : index
    %22 = vector.load %arg4[%c0_16, %c0_17] : memref<56x40xf32, #tpu.memory_space<vmem>>, vector<56x40xf32>
    %cst_18 = arith.constant dense<0.000000e+00> : vector<2x40xf32>
    %23 = tpu.matmul %21, %22, %cst_18 {dimension_numbers = #tpu.dot_dimension_numbers<[1], [0], [0], [1], [0, 0, 1, 1], [], []>, precision = #tpu.contract_precision<fp32>} : vector<2x56xf32>, vector<56x40xf32>, vector<2x40xf32> -> vector<2x40xf32>
    %c3 = arith.constant 3 : index
    %c0_19 = arith.constant 0 : index
    %24 = vector.load %arg5[%c3, %c0_19] : memref<4x256xf32, #tpu.memory_space<vmem>>, vector<1x40xf32>
    %25 = vector.broadcast %24 : vector<1x40xf32> to vector<2x40xf32>
    %26 = arith.addf %23, %25 : vector<2x40xf32>
    %c0_20 = arith.constant 0 : index
    %c0_21 = arith.constant 0 : index
    %27 = vector.load %arg6[%c0_20, %c0_21] : memref<2x40xf32, #tpu.memory_space<vmem>>, vector<2x40xf32>
    tpu.vector_store %arg6[%c0_20, %c0_21], %26 {strides = array<i32>} : memref<2x40xf32, #tpu.memory_space<vmem>>, vector<2x40xf32>,
    return
  }
}

</mosaic_0001>

<bundles_post_ra>
// kernel: decoder_forward.1
= control target key start
LH: loop header
LB: loop body
LE: loop exit
PB: predicated region body
PF: predicated region fallthrough
CT: control target
= control target key end

     0   :  { %vm46_vm0 = vcmask 523264   ;;  %vm559_vm1 = vcmask 982016   ;;  %vm1591_vm2 = vcmask 457728   ;;  %vm1819_vm3 = vcmask 320512   ;;  %s3116_s1 = inlined_call_operand.vmem [shape: f32[64,248], index: 1, kind: input, shape index: {}]   ;;  %s3117_s5 = inlined_call_operand.vmem [shape: f32[4,256], index: 5, kind: input, shape index: {}]   ;;  %s3118_s0 = inlined_call_operand.vmem [shape: f32[2,64], index: 0, kind: input, shape index: {}]   ;;  %s3119_s2 = inlined_call_operand.vmem [shape: f32[248,120], index: 2, kind: input, shape index: {}]   ;;  %s3120_s3 = inlined_call_operand.vmem [shape: f32[120,56], index: 3, kind: input, shape index: {}]   ;;  %s3121_s4 = inlined_call_operand.vmem [shape: f32[56,40], index: 4, kind: input, shape index: {}]   ;;  %s3122_s6 = inlined_call_operand.vmem [shape: f32[2,40], index: 6, kind: output, shape index: {}]  }
   0x1   :  { %v38_v0 = vld [vmem:[%s3116_s1 + $0x70] sm:$0xff]  ;;  %v36_v1 = vld [vmem:[%s3116_s1 + $0x60] sm:$0xff]  ;;  %v39_v22 = vld [vmem:[%s3116_s1 + $0x78] sm:$0xff] }
   0x2   :  { %v34_v2 = vld [vmem:[%s3116_s1 + $0x50] sm:$0xff]  ;;  %v1872_v3 = vand.u32 4294901760, %v38_v0  ;;  %v1874_v4 = vand.u32 4294901760, %v36_v1  ;;  %v32_v6 = vld [vmem:[%s3116_s1 + $0x40] sm:$0xff]  ;;  %v37_v30 = vld [vmem:[%s3116_s1 + $0x68] sm:$0xff]  ;;  %v1952_v34 = vand.u32 4294901760, %v39_v22 }
   0x3   :  { %v1876_v5 = vand.u32 4294901760, %v34_v2  ;;  %v30_v7 = vld [vmem:[%s3116_s1 + $0x30] sm:$0xff]  ;;  %v28_v8 = vld [vmem:[%s3116_s1 + $0x20] sm:$0xff]  ;;  %v1887_v9 = vand.u32 4294901760, %v32_v6  ;;  %v35_v36 = vld [vmem:[%s3116_s1 + $0x58] sm:$0xff]  ;;  %v1969_v41 = vand.u32 4294901760, %v37_v30 }
   0x4   :  { %v1889_v10 = vand.u32 4294901760, %v30_v7  ;;  %v1891_v11 = vand.u32 4294901760, %v28_v8  ;;  %v26_v12 = vld [vmem:[%s3116_s1 + $0x10] sm:$0xff]  ;;  %v24_v13 = vld [vmem:[%s3116_s1] sm:$0xff]  ;;  %v1900_v14 = vsub.f32 %v38_v0, %v1872_v3  ;;  %59 = vmatpush.msra.mxu0 %v1872_v3  ;;  %v1904_v15 = vsub.f32 %v36_v1, %v1874_v4  ;;  %191 = vmatpush.msra.mxu3 %v1872_v3  ;;  %v33_v37 = vld [vmem:[%s3116_s1 + $0x48] sm:$0xff] }
   0x5   :  { %v1908_v16 = vsub.f32 %v34_v2, %v1876_v5  ;;  %v1910_v17 = vand.u32 4294901760, %v26_v12  ;;  %v1913_v18 = vsub.f32 %v32_v6, %v1887_v9  ;;  %v1921_v21 = vand.u32 4294901760, %v24_v13  ;;  %v23_v42 = vld [vmem:[%s3118_s0] sm:$0x3]  ;;  %v31_v43 = vld [vmem:[%s3116_s1 + $0x38] sm:$0xff]  ;;  %v29_v55 = vld [vmem:[%s3116_s1 + $0x28] sm:$0xff] }
   0x6   :  { %v1916_v19 = vsub.f32 %v30_v7, %v1889_v10  ;;  %v1919_v20 = vsub.f32 %v28_v8, %v1891_v11  ;;  %154 = vmatpush.msra.mxu2 %v1900_v14  ;;  %61 = vmatpush.msra.mxu0 %v1874_v4  ;;  %v93_v23 = vand.u32 4294901760, %v1900_v14  ;;  %v99_v24 = vand.u32 4294901760, %v1904_v15  ;;  %v27_v0 = vld [vmem:[%s3116_s1 + $0x18] sm:$0xff] }
   0x7   :  { %v105_v25 = vand.u32 4294901760, %v1908_v16  ;;  %193 = vmatpush.msra.mxu3 %v1874_v4  ;;  %v111_v26 = vand.u32 4294901760, %v1913_v18  ;;  %v1935_v28 = vsub.f32 %v26_v12, %v1910_v17  ;;  %v1956_v35 = vsub.f32 %v24_v13, %v1921_v21 }
   0x8   :  { %v117_v27 = vand.u32 4294901760, %v1916_v19  ;;  %v123_v29 = vand.u32 4294901760, %v1919_v20  ;;  %157 = vmatpush.msra.mxu2 %v1904_v15  ;;  %v94_v31 = vsub.f32 %v1900_v14, %v93_v23  ;;  %63 = vmatpush.msra.mxu0 %v1876_v5  ;;  %v100_v32 = vsub.f32 %v1904_v15, %v99_v24 }
   0x9   :  { %v106_v33 = vsub.f32 %v1908_v16, %v105_v25  ;;  %195 = vmatpush.msra.mxu3 %v1876_v5  ;;  %v112_v40 = vsub.f32 %v1913_v18, %v111_v26  ;;  %v129_v46 = vand.u32 4294901760, %v1935_v28  ;;  %v1987_v48 = vsub.f32 %v39_v22, %v1952_v34 }
   0xa   :  { %v95_v38 = vand.u32 4294901760, %v94_v31  ;;  %160 = vmatpush.msra.mxu2 %v1908_v16  ;;  %v101_v39 = vand.u32 4294901760, %v100_v32  ;;  %65 = vmatpush.msra.mxu0 %v1887_v9  ;;  %v118_v44 = vsub.f32 %v1916_v19, %v117_v27  ;;  %v124_v45 = vsub.f32 %v1919_v20, %v123_v29 }
   0xb   :  { %197 = vmatpush.msra.mxu3 %v1887_v9  ;;  %v107_v47 = vand.u32 4294901760, %v106_v33  ;;  %v1989_v49 = vand.u32 4294901760, %v35_v36  ;;  %v1992_v50 = vsub.f32 %v37_v30, %v1969_v41  ;;  %v135_v51 = vand.u32 4294901760, %v1956_v35  ;;  %v25_v30 = vld [vmem:[%s3116_s1 + $0x8] sm:$0xff] }
   0xc   :  { %96 = vmatpush.msra.mxu1 %v95_v38  ;;  %163 = vmatpush.msra.mxu2 %v1913_v18  ;;  %v1997_v52 = vand.u32 4294901760, %v33_v37  ;;  %v48_v53 = vsel %vm46_vm0, %v23_v42, 0  ;;  %v2000_v54 = vand.u32 4294901760, %v31_v43  ;;  %v113_v56 = vand.u32 4294901760, %v112_v40 }
   0xd   :  { %67 = vmatpush.msra.mxu0 %v1889_v10  ;;  %199 = vmatpush.msra.mxu3 %v1889_v10  ;;  %v330_v57 = vand.u32 4294901760, %v1987_v48  ;;  %v336_v58 = vand.u32 4294901760, %v1992_v50  ;;  %v2009_v59 = vsub.f32 %v35_v36, %v1989_v49  ;;  %v119_v60 = vand.u32 4294901760, %v118_v44 }
   0xe   :  { %102 = vmatpush.msra.mxu1 %v101_v39  ;;  %166 = vmatpush.msra.mxu2 %v1916_v19  ;;  %v130_v61 = vsub.f32 %v1935_v28, %v129_v46  ;;  %v2016_v62 = vand.u32 4294901760, %v48_v53  ;;  %v2019_v63 = vsub.f32 %v33_v37, %v1997_v52  ;;  %v2032_v7 = vand.u32 4294901760, %v29_v55 }
   0xf   :  { %69 = vmatpush.msra.mxu0 %v1891_v11  ;;  %201 = vmatpush.msra.mxu3 %v1891_v11  ;;  %v331_v1 = vsub.f32 %v1987_v48, %v330_v57  ;;  %v337_v2 = vsub.f32 %v1992_v50, %v336_v58  ;;  %v342_v6 = vand.u32 4294901760, %v2009_v59  ;;  %v125_v8 = vand.u32 4294901760, %v124_v45 }
  0x10   :  { %108 = vmatpush.msra.mxu1 %v107_v47  ;;  %169 = vmatpush.msra.mxu2 %v1919_v20  ;;  %v136_v12 = vsub.f32 %v1956_v35, %v135_v51  ;;  %v2040_v13 = vsub.f32 %v48_v53, %v2016_v62  ;;  %v2043_v22 = vsub.f32 %v31_v43, %v2000_v54  ;;  %v348_v33 = vand.u32 4294901760, %v2019_v63 }
  0x11   :  { %71 = vmatpush.msra.mxu0 %v1910_v17  ;;  %203 = vmatpush.msra.mxu3 %v1910_v17  ;;  %v332_v31 = vand.u32 4294901760, %v331_v1  ;;  %v343_v32 = vsub.f32 %v2009_v59, %v342_v6  ;;  %v2053_v36 = vand.u32 4294901760, %v27_v0  ;;  %v131_v38 = vand.u32 4294901760, %v130_v61 }
  0x12   :  { %114 = vmatpush.msra.mxu1 %v113_v56  ;;  %172 = vmatpush.msra.mxu2 %v1935_v28  ;;  %v2058_v37 = vand.u32 4294901760, %v2040_v13  ;;  %v338_v39 = vand.u32 4294901760, %v337_v2  ;;  %v2062_v40 = vsub.f32 %v29_v55, %v2032_v7  ;;  %v2064_v42 = vand.u32 4294901760, %v25_v30  ;;  %v537_v28 = vld [vmem:[%s3119_s2 + $0x58] sm:$0xff] }
  0x13   :  { %73 = vmatpush.msra.mxu0 %v1921_v21  ;;  %205 = vmatpush.msra.mxu3 %v1921_v21  ;;  %v137_v43 = vand.u32 4294901760, %v136_v12  ;;  %v354_v44 = vand.u32 4294901760, %v2043_v22  ;;  %v344_v45 = vand.u32 4294901760, %v343_v32  ;;  %v349_v47 = vsub.f32 %v2019_v63, %v348_v33  ;;  %v532_v12 = vld [vmem:[%s3119_s2 + $0x30] sm:$0xff] }
  0x14   :  { %120 = vmatpush.msra.mxu1 %v119_v60  ;;  %175 = vmatpush.msra.mxu2 %v1956_v35  ;;  %v77_v53 = vsub.f32 %v2040_v13, %v2058_v37  ;;  %v2076_v55 = vsub.f32 %v27_v0, %v2053_v36  ;;  %v360_v14 = vand.u32 4294901760, %v2062_v40  ;;  %v536_v35 = vld [vmem:[%s3119_s2 + $0x50] sm:$0xff] }
  0x15   :  { %224 = vmatpush.msrb.mxu0 %v93_v23  ;;  %333 = vmatpush.msrb.mxu3 %v332_v31  ;;  %v2083_v23 = vsub.f32 %v25_v30, %v2064_v42  ;;  %v355_v56 = vsub.f32 %v2043_v22, %v354_v44  ;;  %v350_v15 = vand.u32 4294901760, %v349_v47 }
  0x16   :  { %296 = vmatpush.msrb.mxu2 %v1952_v34  ;;  %126 = vmatpush.msra.mxu1 %v125_v8  ;;  %v366_v60 = vand.u32 4294901760, %v2076_v55  ;;  %v361_v16 = vsub.f32 %v2062_v40, %v360_v14 }
  0x17   :  { %228 = vmatpush.msrb.mxu0 %v99_v24  ;;  %339 = vmatpush.msrb.mxu3 %v338_v39  ;;  %v78_v24 = vand.u32 4294901760, %v77_v53  ;;  %v356_v61 = vand.u32 4294901760, %v355_v56 }
  0x18   :  { %298 = vmatpush.msrb.mxu2 %v1969_v41  ;;  %132 = vmatpush.msra.mxu1 %v131_v38  ;;  %v362_v18 = vand.u32 4294901760, %v361_v16  ;;  %v2258_v38 = vand.u32 4294901760, %v532_v12 }
  0x19   :  { %232 = vmatpush.msrb.mxu0 %v105_v25  ;;  %345 = vmatpush.msrb.mxu3 %v344_v45  ;;  %v372_v25 = vand.u32 4294901760, %v2083_v23 }
  0x1a   :  { %300 = vmatpush.msrb.mxu2 %v1989_v49  ;;  %138 = vmatpush.msra.mxu1 %v137_v43  ;;  %v2288_v53 = vsub.f32 %v532_v12, %v2258_v38 }
  0x1b   :  { %178 = vmatmul.f32.vlgmr.msra.gmra.mxu2 %v2040_v13  ;;  %236 = vmatpush.msrb.mxu0 %v111_v26  ;;  %v538_v26 = vld [vmem:[%s3119_s2 + $0x60] sm:$0xff] }
  0x1c   :  { %267 = vmatpush.msrb.mxu1 %v1872_v3  ;;  %302 = vmatpush.msrb.mxu2 %v1997_v52  ;;  %v367_v3 = vsub.f32 %v2076_v55, %v366_v60 }
  0x1d   :  { %351 = vmatpush.msrb.mxu3 %v350_v15  ;;  %79 = vmatmul.f32.vlgmr.msra.gmra.mxu0 %v78_v24 }
  0x1e   :  { %269 = vmatpush.msrb.mxu1 %v1874_v4  ;;  %304 = vmatpush.msrb.mxu2 %v2000_v54  ;;  %v373_v4 = vsub.f32 %v2083_v23, %v372_v25 }
  0x1f   :  { %209 = vmatmul.f32.vlgmr.msra.gmra.mxu3 %v2058_v37  ;;  %240 = vmatpush.msrb.mxu0 %v117_v27 }
  0x20   :  { %271 = vmatpush.msrb.mxu1 %v1876_v5  ;;  %306 = vmatpush.msrb.mxu2 %v2032_v7  ;;  %v368_v5 = vand.u32 4294901760, %v367_v3  ;;  %v374_v19 = vand.u32 4294901760, %v373_v4  ;;  %v527_v4 = vld [vmem:[%s3119_s2 + $0x8] sm:$0xff] }
  0x21   :  { %357 = vmatpush.msrb.mxu3 %v356_v61  ;;  %140 = vmatmul.f32.vlgmr.msra.gmra.mxu1 %v2016_v62 }
  0x22   :  { %273 = vmatpush.msrb.mxu1 %v1887_v9  ;;  %244 = vmatpush.msrb.mxu0 %v123_v29  ;;  %v541_v9 = vld [vmem:[%s3119_s2 + $0x78] sm:$0xff] }
  0x23   :  { %308 = vmatpush.msrb.mxu2 %v2053_v36  ;;  %363 = vmatpush.msrb.mxu3 %v362_v18  ;;  %v660_v18 = vand.u32 4294901760, %v2288_v53 }
  0x24   :  { %275 = vmatpush.msrb.mxu1 %v1889_v10  ;;  %248 = vmatpush.msrb.mxu0 %v129_v46  ;;  %v540_v10 = vld [vmem:[%s3119_s2 + $0x70] sm:$0xff] }
  0x25   :  { %310 = vmatpush.msrb.mxu2 %v2064_v42  ;;  %369 = vmatpush.msrb.mxu3 %v368_v5  ;;  %v2148_v20 = vand.u32 4294901760, %v540_v10 }
  0x26   :  { %277 = vmatpush.msrb.mxu1 %v1891_v11  ;;  %252 = vmatpush.msrb.mxu0 %v135_v51  ;;  %v2139_v11 = vand.u32 4294901760, %v541_v9 }
  0x27   :  { %461 = vmatpush.msra.mxu2 %v330_v57  ;;  %375 = vmatpush.msrb.mxu3 %v374_v19  ;;  %v2171_v29 = vsub.f32 %v540_v10, %v2148_v20  ;;  %v2201_v57 = vand.u32 4294901760, %v536_v35 }
  0x28   :  { %279 = vmatpush.msrb.mxu1 %v1910_v17  ;;  %254 = vmatmul.f32.vlgmr.msrb.gmra.mxu0 %v2016_v62  ;;  %v539_v17 = vld [vmem:[%s3119_s2 + $0x68] sm:$0xff] }
  0x29   :  { %391 = vmatpush.msra.mxu0 %v1987_v48  ;;  %465 = vmatpush.msra.mxu2 %v336_v58  ;;  %v2161_v27 = vand.u32 4294901760, %v539_v17  ;;  %v2187_v48 = vand.u32 4294901760, %v537_v28  ;;  %v534_v58 = vld [vmem:[%s3119_s2 + $0x40] sm:$0xff]  ;;  %v2235_v8 = vsub.f32 %v536_v35, %v2201_v57 }
  0x2a   :  { %504 = vmatpush.msra.mxu3 %v1952_v34  ;;  %281 = vmatpush.msrb.mxu1 %v1921_v21  ;;  %v2159_v21 = vsub.f32 %v541_v9, %v2139_v11  ;;  %v2222_v1 = vand.u32 4294901760, %v534_v58 }
  0x2b   :  { %283 = vmatmul.f32.vlgmr.msrb.gmra.mxu1 %v2016_v62  ;;  %394 = vmatpush.msra.mxu0 %v1992_v50  ;;  %v2185_v46 = vsub.f32 %v539_v17, %v2161_v27  ;;  %v612_v50 = vand.u32 4294901760, %v2171_v29  ;;  %v2218_v0 = vsub.f32 %v537_v28, %v2187_v48  ;;  %v526_v17 = vld [vmem:[%s3119_s2] sm:$0xff] }
  0x2c   :  { %428 = vmatpush.msra.mxu1 %v1952_v34  ;;  %469 = vmatpush.msra.mxu2 %v342_v6  ;;  %v2173_v34 = vand.u32 4294901760, %v538_v26 }
  0x2d   :  { %506 = vmatpush.msra.mxu3 %v1969_v41  ;;  %397 = vmatpush.msra.mxu0 %v2009_v59  ;;  %v613_v2 = vsub.f32 %v2171_v29, %v612_v50  ;;  %v630_v31 = vand.u32 4294901760, %v2218_v0 }
  0x2e   :  { %430 = vmatpush.msra.mxu1 %v1969_v41  ;;  %473 = vmatpush.msra.mxu2 %v348_v33  ;;  %v606_v41 = vand.u32 4294901760, %v2159_v21  ;;  %v2199_v51 = vsub.f32 %v538_v26, %v2173_v34  ;;  %v2256_v33 = vsub.f32 %v534_v58, %v2222_v1  ;;  %v556_v26 = vld [vmem:[%s3119_s2 + $0xf0] sm:$0xff]  ;;  %v2345_v58 = vand.u32 4294901760, %v527_v4 }
  0x2f   :  { %508 = vmatpush.msra.mxu3 %v1989_v49  ;;  %316 = vmatmul.f32.vlgmr.msrb.gmra.mxu2 %v78_v24  ;;  %v614_v39 = vand.u32 4294901760, %v613_v2  ;;  %v528_v24 = vld [vmem:[%s3119_s2 + $0x10] sm:$0xff] }
  0x30   :  { %400 = vmatpush.msra.mxu0 %v2019_v63  ;;  %432 = vmatpush.msra.mxu1 %v1989_v49  ;;  %v535_v49 = vld [vmem:[%s3119_s2 + $0x48] sm:$0xff]  ;;  %v618_v63 = vand.u32 4294901760, %v2185_v46  ;;  %v624_v6 = vand.u32 4294901760, %v2199_v51  ;;  %v648_v47 = vand.u32 4294901760, %v2256_v33  ;;  %v2327_v9 = vand.u32 4294901760, %v528_v24 }
  0x31   :  { %477 = vmatpush.msra.mxu2 %v354_v44  ;;  %510 = vmatpush.msra.mxu3 %v1997_v52  ;;  %v2208_v59 = vand.u32 4294901760, %v535_v49  ;;  %v530_v44 = vld [vmem:[%s3119_s2 + $0x20] sm:$0xff] }
  0x32   :  { %377 = vmatmul.f32.vlgmr.msrb.gmra.mxu3 %v2016_v62  ;;  %403 = vmatpush.msra.mxu0 %v2043_v22  ;;  %v619_v30 = vsub.f32 %v2185_v46, %v618_v63  ;;  %v2297_v56 = vand.u32 4294901760, %v530_v44  ;;  %v649_v3 = vsub.f32 %v2256_v33, %v648_v47  ;;  %v2355_v12 = vsub.f32 %v528_v24, %v2327_v9 }
  0x33   :  { %434 = vmatpush.msra.mxu1 %v1997_v52  ;;  %481 = vmatpush.msra.mxu2 %v360_v14  ;;  %v607_v52 = vsub.f32 %v2159_v21, %v606_v41 }
  0x34   :  { %512 = vmatpush.msra.mxu3 %v2000_v54  ;;  %406 = vmatpush.msra.mxu0 %v2062_v40  ;;  %v625_v40 = vsub.f32 %v2199_v51, %v624_v6  ;;  %v2325_v19 = vsub.f32 %v530_v44, %v2297_v56 }
  0x35   :  { %436 = vmatpush.msra.mxu1 %v2000_v54  ;;  %485 = vmatpush.msra.mxu2 %v366_v60  ;;  %v533_v54 = vld [vmem:[%s3119_s2 + $0x38] sm:$0xff]  ;;  %v608_v22 = vand.u32 4294901760, %v607_v52  ;;  %v650_v52 = vand.u32 4294901760, %v649_v3 }
  0x36   :  { %514 = vmatpush.msra.mxu3 %v2032_v7  ;;  %409 = vmatpush.msra.mxu0 %v2076_v55  ;;  %v2251_v32 = vand.u32 4294901760, %v533_v54  ;;  %v529_v55 = vld [vmem:[%s3119_s2 + $0x18] sm:$0xff]  ;;  %v626_v14 = vand.u32 4294901760, %v625_v40  ;;  %v672_v2 = vand.u32 4294901760, %v2325_v19 }
  0x37   :  { %438 = vmatpush.msra.mxu1 %v2032_v7  ;;  %489 = vmatpush.msra.mxu2 %v372_v25  ;;  %v2243_v7 = vsub.f32 %v535_v49, %v2208_v59  ;;  %v2312_v61 = vand.u32 4294901760, %v529_v55  ;;  %v553_v3 = vld [vmem:[%s3119_s2 + $0xd8] sm:$0xff] }
  0x38   :  { %516 = vmatpush.msra.mxu3 %v2053_v36  ;;  %491 = vmatmul.f32.vlgmr.msra.gmra.mxu2 %v2016_v62  ;;  %v2280_v45 = vsub.f32 %v533_v54, %v2251_v32  ;;  %v661_v54 = vsub.f32 %v2288_v53, %v660_v18 }
  0x39   :  { %412 = vmatpush.msra.mxu0 %v2083_v23  ;;  %440 = vmatpush.msra.mxu1 %v2053_v36  ;;  %v531_v36 = vld [vmem:[%s3119_s2 + $0x28] sm:$0xff]  ;;  %v642_v43 = vand.u32 4294901760, %v2243_v7  ;;  %v2343_v49 = vsub.f32 %v529_v55, %v2312_v61 }
  0x3a   :  { %518 = vmatpush.msra.mxu3 %v2064_v42  ;;  %415 = vmatmul.f32.vlgmr.msra.gmra.mxu0 %v2040_v13  ;;  %v636_v13 = vand.u32 4294901760, %v2235_v8  ;;  %v654_v16 = vand.u32 4294901760, %v2280_v45  ;;  %v662_v55 = vand.u32 4294901760, %v661_v54 }
  0x3b   :  { %520 = vmatmul.f32.vlgmr.msra.gmra.mxu3 %v2016_v62  ;;  %442 = vmatpush.msra.mxu1 %v2064_v42  ;;  %v620_v62 = vand.u32 4294901760, %v619_v30  ;;  %v631_v42 = vsub.f32 %v2218_v0, %v630_v31  ;;  %v643_v15 = vsub.f32 %v2243_v7, %v642_v43  ;;  %v2359_v30 = vand.u32 4294901760, %v556_v26 }
  0x3c   :  { %446 = vmatmul.f32.vlgmr.msra.gmra.mxu1 %v2058_v37  ;;  %760 = vmatpush.msrb.mxu3 %v2139_v11  ;;  %v2282_v37 = vand.u32 4294901760, %v531_v36  ;;  %v637_v23 = vsub.f32 %v2235_v8, %v636_v13  ;;  %v655_v28 = vsub.f32 %v2280_v45, %v654_v16  ;;  %v3124_v44 = vand.u32 4294901760, %v2343_v49 }
  0x3d   :  { %609 = vmatpush.msrb.mxu1 %v608_v22  ;;  %564 = vmatpush.msrb.mxu0 %v2139_v11  ;;  %v632_v60 = vand.u32 4294901760, %v631_v42  ;;  %v644_v10 = vand.u32 4294901760, %v643_v15  ;;  %v2357_v22 = vand.u32 4294901760, %v526_v17  ;;  %v554_v42 = vld [vmem:[%s3119_s2 + $0xe0] sm:$0xff]  ;;  %v3123_v15 = vand.u32 4294901760, %v2355_v12 }
  0x3e   :  { %762 = vmatpush.msrb.mxu3 %v2148_v20  ;;  %707 = vmatpush.msrb.mxu2 %v2159_v21  ;;  %v2310_v25 = vsub.f32 %v531_v36, %v2282_v37  ;;  %v638_v5 = vand.u32 4294901760, %v637_v23  ;;  %v555_v36 = vld [vmem:[%s3119_s2 + $0xe8] sm:$0xff]  ;;  %v673_v23 = vsub.f32 %v2325_v19, %v672_v2 }
  0x3f   :  { %615 = vmatpush.msrb.mxu1 %v614_v39  ;;  %566 = vmatpush.msrb.mxu0 %v2148_v20  ;;  %v656_v39 = vand.u32 4294901760, %v655_v28  ;;  %v2387_v24 = vsub.f32 %v526_v17, %v2357_v22  ;;  %v2409_v28 = vand.u32 4294901760, %v553_v3  ;;  %v685_v54 = vsub.f32 %v2355_v12, %v3123_v15 }
  0x40   :  { %764 = vmatpush.msrb.mxu3 %v2161_v27  ;;  %710 = vmatpush.msrb.mxu2 %v2171_v29  ;;  %v666_v35 = vand.u32 4294901760, %v2310_v25  ;;  %v551_v29 = vld [vmem:[%s3119_s2 + $0xc8] sm:$0xff] }
  0x41   :  { %621 = vmatpush.msrb.mxu1 %v620_v62  ;;  %568 = vmatpush.msrb.mxu0 %v2161_v27  ;;  %v2372_v62 = vsub.f32 %v527_v4, %v2345_v58  ;;  %v2397_v4 = vand.u32 4294901760, %v554_v42 }
  0x42   :  { %766 = vmatpush.msrb.mxu3 %v2173_v34  ;;  %713 = vmatpush.msrb.mxu2 %v2185_v46  ;;  %v667_v40 = vsub.f32 %v2310_v25, %v666_v35 }
  0x43   :  { %627 = vmatpush.msrb.mxu1 %v626_v14  ;;  %570 = vmatpush.msrb.mxu0 %v2173_v34  ;;  %v2379_v14 = vand.u32 4294901760, %v555_v36  ;;  %v3125_v17 = vand.u32 4294901760, %v2372_v62  ;;  %v3130_v46 = vand.u32 4294901760, %v2372_v62 }
  0x44   :  { %768 = vmatpush.msrb.mxu3 %v2187_v48  ;;  %716 = vmatpush.msrb.mxu2 %v2199_v51 }
  0x45   :  { %633 = vmatpush.msrb.mxu1 %v632_v60  ;;  %572 = vmatpush.msrb.mxu0 %v2187_v48  ;;  %v2390_v60 = vsub.f32 %v556_v26, %v2359_v30  ;;  %v2407_v26 = vsub.f32 %v555_v36, %v2379_v14  ;;  %v2420_v36 = vsub.f32 %v554_v42, %v2397_v4  ;;  %v686_v42 = vand.u32 4294901760, %v685_v54 }
  0x46   :  { %770 = vmatpush.msrb.mxu3 %v2201_v57  ;;  %719 = vmatpush.msrb.mxu2 %v2218_v0 }
  0x47   :  { %639 = vmatpush.msrb.mxu1 %v638_v5  ;;  %574 = vmatpush.msrb.mxu0 %v2201_v57  ;;  %v668_v5 = vand.u32 4294901760, %v667_v40  ;;  %v3126_v40 = vand.u32 4294901760, %v2390_v60  ;;  %v953_v15 = vand.u32 4294901760, %v2407_v26 }
  0x48   :  { %772 = vmatpush.msrb.mxu3 %v2208_v59  ;;  %722 = vmatpush.msrb.mxu2 %v2235_v8 }
  0x49   :  { %645 = vmatpush.msrb.mxu1 %v644_v10  ;;  %576 = vmatpush.msrb.mxu0 %v2208_v59  ;;  %v679_v10 = vsub.f32 %v2343_v49, %v3124_v44  ;;  %v2430_v44 = vsub.f32 %v553_v3, %v2409_v28 }
  0x4a   :  { %774 = vmatpush.msrb.mxu3 %v2222_v1  ;;  %725 = vmatpush.msrb.mxu2 %v2243_v7  ;;  %v548_v7 = vld [vmem:[%s3119_s2 + $0xb0] sm:$0xff] }
  0x4b   :  { %651 = vmatpush.msrb.mxu1 %v650_v52  ;;  %578 = vmatpush.msrb.mxu0 %v2222_v1  ;;  %v674_v52 = vand.u32 4294901760, %v673_v23  ;;  %v691_v23 = vsub.f32 %v2372_v62, %v3125_v17  ;;  %v959_v17 = vand.u32 4294901760, %v2420_v36  ;;  %v965_v54 = vand.u32 4294901760, %v2430_v44 }
  0x4c   :  { %776 = vmatpush.msrb.mxu3 %v2251_v32  ;;  %728 = vmatpush.msrb.mxu2 %v2256_v33 }
  0x4d   :  { %657 = vmatpush.msrb.mxu1 %v656_v39  ;;  %580 = vmatpush.msrb.mxu0 %v2251_v32  ;;  %v3127_v39 = vand.u32 4294901760, %v2387_v24  ;;  %v692_v3 = vand.u32 4294901760, %v691_v23 }
  0x4e   :  { %778 = vmatpush.msrb.mxu3 %v2258_v38  ;;  %731 = vmatpush.msrb.mxu2 %v2280_v45 }
  0x4f   :  { %663 = vmatpush.msrb.mxu1 %v662_v55  ;;  %582 = vmatpush.msrb.mxu0 %v2258_v38  ;;  %v680_v55 = vand.u32 4294901760, %v679_v10  ;;  %v948_v10 = vsub.f32 %v2390_v60, %v3126_v40 }
  0x50   :  { %780 = vmatpush.msrb.mxu3 %v2282_v37  ;;  %734 = vmatpush.msrb.mxu2 %v2288_v53 }
  0x51   :  { %669 = vmatpush.msrb.mxu1 %v668_v5  ;;  %584 = vmatpush.msrb.mxu0 %v2282_v37  ;;  %v697_v5 = vsub.f32 %v2387_v24, %v3127_v39  ;;  %v949_v39 = vand.u32 4294901760, %v948_v10 }
  0x52   :  { %782 = vmatpush.msrb.mxu3 %v2297_v56  ;;  %737 = vmatpush.msrb.mxu2 %v2310_v25 }
  0x53   :  { %675 = vmatpush.msrb.mxu1 %v674_v52  ;;  %586 = vmatpush.msrb.mxu0 %v2297_v56  ;;  %v954_v52 = vsub.f32 %v2407_v26, %v953_v15  ;;  %v698_v40 = vand.u32 4294901760, %v697_v5 }
  0x54   :  { %784 = vmatpush.msrb.mxu3 %v2312_v61  ;;  %740 = vmatpush.msrb.mxu2 %v2325_v19 }
  0x55   :  { %681 = vmatpush.msrb.mxu1 %v680_v55  ;;  %588 = vmatpush.msrb.mxu0 %v2312_v61  ;;  %v960_v55 = vsub.f32 %v2420_v36, %v959_v17  ;;  %v955_v23 = vand.u32 4294901760, %v954_v52 }
  0x56   :  { %786 = vmatpush.msrb.mxu3 %v2327_v9  ;;  %743 = vmatpush.msrb.mxu2 %v2343_v49 }
  0x57   :  { %687 = vmatpush.msrb.mxu1 %v686_v42  ;;  %590 = vmatpush.msrb.mxu0 %v2327_v9  ;;  %v966_v42 = vsub.f32 %v2430_v44, %v965_v54  ;;  %v961_v5 = vand.u32 4294901760, %v960_v55  ;;  %v543_v55 = vld [vmem:[%s3119_s2 + $0x88] sm:$0xff] }
  0x58   :  { %788 = vmatpush.msrb.mxu3 %v2345_v58  ;;  %746 = vmatpush.msrb.mxu2 %v2355_v12 }
  0x59   :  { %693 = vmatpush.msrb.mxu1 %v692_v3  ;;  %592 = vmatpush.msrb.mxu0 %v2345_v58  ;;  %v967_v10 = vand.u32 4294901760, %v966_v42 }
  0x5a   :  { %790 = vmatpush.msrb.mxu3 %v2357_v22  ;;  %749 = vmatpush.msrb.mxu2 %v2372_v62  ;;  %v544_v62 = vld [vmem:[%s3119_s2 + $0x90] sm:$0xff] }
  0x5b   :  { %699 = vmatpush.msrb.mxu1 %v698_v40  ;;  %594 = vmatpush.msrb.mxu0 %v2357_v22  ;;  %v2614_v3 = vand.u32 4294901760, %v544_v62 }
  0x5c   :  { %950 = vmatpush.msra.mxu3 %v949_v39  ;;  %752 = vmatpush.msrb.mxu2 %v2387_v24 }
  0x5d   :  { %868 = vmatpush.msra.mxu1 %v2139_v11  ;;  %801 = vmatpush.msra.mxu0 %v606_v41  ;;  %v3128_v11 = vand.u32 4294901760, %v2343_v49  ;;  %v2521_v41 = vand.u32 4294901760, %v551_v29 }
  0x5e   :  { %956 = vmatpush.msra.mxu3 %v955_v23  ;;  %906 = vmatpush.msra.mxu2 %v2359_v30 }
  0x5f   :  { %870 = vmatpush.msra.mxu1 %v2148_v20  ;;  %805 = vmatpush.msra.mxu0 %v612_v50  ;;  %v552_v20 = vld [vmem:[%s3119_s2 + $0xd0] sm:$0xff]  ;;  %v2532_v51 = vsub.f32 %v551_v29, %v2521_v41 }
  0x60   :  { %962 = vmatpush.msra.mxu3 %v961_v5  ;;  %908 = vmatpush.msra.mxu2 %v2379_v14  ;;  %v2510_v21 = vand.u32 4294901760, %v552_v20 }
  0x61   :  { %872 = vmatpush.msra.mxu1 %v2161_v27  ;;  %809 = vmatpush.msra.mxu0 %v618_v63  ;;  %v3129_v27 = vand.u32 4294901760, %v2355_v12  ;;  %v549_v63 = vld [vmem:[%s3119_s2 + $0xb8] sm:$0xff] }
  0x62   :  { %968 = vmatpush.msra.mxu3 %v967_v10  ;;  %910 = vmatpush.msra.mxu2 %v2397_v4  ;;  %v2549_v8 = vand.u32 4294901760, %v549_v63  ;;  %v2625_v10 = vsub.f32 %v544_v62, %v2614_v3 }
  0x63   :  { %874 = vmatpush.msra.mxu1 %v2173_v34  ;;  %813 = vmatpush.msra.mxu0 %v624_v6  ;;  %v2519_v34 = vsub.f32 %v552_v20, %v2510_v21  ;;  %v542_v20 = vld [vmem:[%s3119_s2 + $0x80] sm:$0xff] }
  0x64   :  { %912 = vmatpush.msra.mxu2 %v2409_v28 }
  0x65   :  { %876 = vmatpush.msra.mxu1 %v2187_v48  ;;  %817 = vmatpush.msra.mxu0 %v630_v31  ;;  %v550_v48 = vld [vmem:[%s3119_s2 + $0xc0] sm:$0xff]  ;;  %v971_v50 = vand.u32 4294901760, %v2519_v34 }
  0x66   :  { %914 = vmatpush.msra.mxu2 %v2510_v21 }
  0x67   :  { %878 = vmatpush.msra.mxu1 %v2201_v57  ;;  %821 = vmatpush.msra.mxu0 %v636_v13  ;;  %v2534_v57 = vand.u32 4294901760, %v550_v48  ;;  %v972_v0 = vsub.f32 %v2519_v34, %v971_v50  ;;  %v2563_v13 = vand.u32 4294901760, %v548_v7 }
  0x68   :  { %916 = vmatpush.msra.mxu2 %v2521_v41 }
  0x69   :  { %880 = vmatpush.msra.mxu1 %v2208_v59  ;;  %825 = vmatpush.msra.mxu0 %v642_v43  ;;  %v3131_v59 = vand.u32 4294901760, %v2387_v24  ;;  %v2547_v6 = vsub.f32 %v550_v48, %v2534_v57  ;;  %v973_v31 = vand.u32 4294901760, %v972_v0  ;;  %v547_v43 = vld [vmem:[%s3119_s2 + $0xa8] sm:$0xff]  ;;  %v2637_v48 = vand.u32 4294901760, %v542_v20 }
  0x6a   :  { %918 = vmatpush.msra.mxu2 %v2534_v57  ;;  %v2572_v53 = vand.u32 4294901760, %v547_v43 }
  0x6b   :  { %882 = vmatpush.msra.mxu1 %v2222_v1  ;;  %829 = vmatpush.msra.mxu0 %v648_v47  ;;  %v977_v1 = vand.u32 4294901760, %v2532_v51  ;;  %v983_v33 = vand.u32 4294901760, %v2547_v6 }
  0x6c   :  { %920 = vmatpush.msra.mxu2 %v2549_v8  ;;  %974 = vmatpush.msra.mxu3 %v973_v31 }
  0x6d   :  { %884 = vmatpush.msra.mxu1 %v2251_v32  ;;  %833 = vmatpush.msra.mxu0 %v654_v16  ;;  %v978_v32 = vsub.f32 %v2532_v51, %v977_v1  ;;  %v546_v16 = vld [vmem:[%s3119_s2 + $0xa0] sm:$0xff] }
  0x6e   :  { %922 = vmatpush.msra.mxu2 %v2563_v13  ;;  %v2587_v19 = vand.u32 4294901760, %v546_v16 }
  0x6f   :  { %886 = vmatpush.msra.mxu1 %v2258_v38  ;;  %837 = vmatpush.msra.mxu0 %v660_v18  ;;  %v2560_v38 = vsub.f32 %v549_v63, %v2549_v8  ;;  %v979_v45 = vand.u32 4294901760, %v978_v32  ;;  %v2585_v18 = vsub.f32 %v547_v43, %v2572_v53 }
  0x70   :  { %924 = vmatpush.msra.mxu2 %v2572_v53 }
  0x71   :  { %888 = vmatpush.msra.mxu1 %v2282_v37  ;;  %841 = vmatpush.msra.mxu0 %v666_v35  ;;  %v984_v37 = vsub.f32 %v2547_v6, %v983_v33  ;;  %v989_v47 = vand.u32 4294901760, %v2560_v38  ;;  %v545_v35 = vld [vmem:[%s3119_s2 + $0x98] sm:$0xff] }
  0x72   :  { %980 = vmatpush.msra.mxu3 %v979_v45  ;;  %v2598_v12 = vand.u32 4294901760, %v545_v35  ;;  %926 = vmatpush.msra.mxu2 %v2587_v19 }
  0x73   :  { %890 = vmatpush.msra.mxu1 %v2297_v56  ;;  %845 = vmatpush.msra.mxu0 %v672_v2  ;;  %v2575_v56 = vsub.f32 %v548_v7, %v2563_v13  ;;  %v985_v25 = vand.u32 4294901760, %v984_v37  ;;  %v2596_v2 = vsub.f32 %v546_v16, %v2587_v19  ;;  %v2647_v7 = vsub.f32 %v542_v20, %v2637_v48 }
  0x74   :  { %v2612_v40 = vsub.f32 %v545_v35, %v2598_v12  ;;  %928 = vmatpush.msra.mxu2 %v2598_v12 }
  0x75   :  { %892 = vmatpush.msra.mxu1 %v2312_v61  ;;  %849 = vmatpush.msra.mxu0 %v3128_v11  ;;  %v990_v61 = vsub.f32 %v2560_v38, %v989_v47  ;;  %v1007_v39 = vand.u32 4294901760, %v2596_v2  ;;  %v2627_v11 = vand.u32 4294901760, %v543_v55  ;;  %v1031_v43 = vand.u32 4294901760, %v2647_v7 }
  0x76   :  { %986 = vmatpush.msra.mxu3 %v985_v25  ;;  %v1013_v5 = vand.u32 4294901760, %v2612_v40  ;;  %930 = vmatpush.msra.mxu2 %v2614_v3 }
  0x77   :  { %894 = vmatpush.msra.mxu1 %v2327_v9  ;;  %853 = vmatpush.msra.mxu0 %v3129_v27  ;;  %v995_v9 = vand.u32 4294901760, %v2575_v56  ;;  %v991_v49 = vand.u32 4294901760, %v990_v61  ;;  %v1008_v42 = vsub.f32 %v2596_v2, %v1007_v39  ;;  %v1032_v37 = vsub.f32 %v2647_v7, %v1031_v43  ;;  %v40_v61 = vld [vmem:[%s3117_s5] ss:$4 sm:$0x3] }
  0x78   :  { %v1014_v29 = vsub.f32 %v2612_v40, %v1013_v5  ;;  %932 = vmatpush.msra.mxu2 %v2627_v11  ;;  %v42_v35 = vperm.slane %v40_v61, 0 }
  0x79   :  { %896 = vmatpush.msra.mxu1 %v2345_v58  ;;  %857 = vmatpush.msra.mxu0 %v3130_v46  ;;  %v1001_v58 = vand.u32 4294901760, %v2585_v18  ;;  %v1009_v27 = vand.u32 4294901760, %v1008_v42  ;;  %v1019_v46 = vand.u32 4294901760, %v2625_v10  ;;  %v1033_v25 = vand.u32 4294901760, %v1032_v37 }
  0x7a   :  { %992 = vmatpush.msra.mxu3 %v991_v49  ;;  %v1015_v63 = vand.u32 4294901760, %v1014_v29  ;;  %934 = vmatpush.msra.mxu2 %v2637_v48  ;;  %v43_v37 = vperm.slane %v40_v61, 1 }
  0x7b   :  { %898 = vmatpush.msra.mxu1 %v2357_v22  ;;  %861 = vmatpush.msra.mxu0 %v3131_v59  ;;  %v996_v22 = vsub.f32 %v2575_v56, %v995_v9  ;;  %v1002_v24 = vsub.f32 %v2585_v18, %v1001_v58  ;;  %v2640_v59 = vsub.f32 %v543_v55, %v2627_v11 }
  0x7c   :  { %v1020_v0 = vsub.f32 %v2625_v10, %v1019_v46 }
  0x7d   :  { %v997_v52 = vand.u32 4294901760, %v996_v22  ;;  %v1003_v23 = vand.u32 4294901760, %v1002_v24  ;;  %v1025_v31 = vand.u32 4294901760, %v2640_v59 }
  0x7e   :  { %v1021_v32 = vand.u32 4294901760, %v1020_v0 }
  0x7f   :  { %998 = vmatpush.msra.mxu3 %v997_v52  ;;  %v1026_v45 = vsub.f32 %v2640_v59, %v1025_v31 }
  0x81   :  { %1004 = vmatpush.msra.mxu3 %v1003_v23  ;;  %v1027_v16 = vand.u32 4294901760, %v1026_v45 }
  0x83   :  { %1010 = vmatpush.msra.mxu3 %v1009_v27 }
  0x85   :  { %1016 = vmatpush.msra.mxu3 %v1015_v63 }
  0x87   :  { %1022 = vmatpush.msra.mxu3 %v1021_v32 }
  0x89   :  { %1028 = vmatpush.msra.mxu3 %v1027_v16 }
  0x8b   :  { %1034 = vmatpush.msra.mxu3 %v1033_v25 }
  0x9a   :  { %v80_v49 = vpop.f32.mrf.mxu0 }
  0x9b   :  { %v81_v22 = vadd.f32 %v80_v49, %v42_v35 }
  0x9e   :  { %v141_v62 = vpop.f32.mrf.mxu1  ;;  %v179_v24 = vpop.f32.mrf.mxu2 }
  0x9f   :  { %v142_v52 = vadd.f32 %v141_v62, %v81_v22 }
  0xa1   :  { %v180_v55 = vadd.f32 %v179_v24, %v142_v52 }
  0xa2   :  { %v210_v23 = vpop.f32.mrf.mxu3 }
  0xa3   :  { %v211_v42 = vadd.f32 %v210_v23, %v180_v55  ;;  %v3132_v55 = vand.u32 4294901760, %v2390_v60 }
  0xa5   :  { %v255_v20 = vpop.f32.mrf.mxu0 }
  0xa6   :  { %v256_v27 = vadd.f32 %v255_v20, %v211_v42  ;;  %v1240_v42 = vld [vmem:[%s3120_s3 + $0x38] sm:$0xff] }
  0xa8   :  { %v284_v29 = vpop.f32.mrf.mxu1 }
  0xa9   :  { %v285_v63 = vadd.f32 %v284_v29, %v256_v27 }
  0xab   :  { %v524_v0 = vmax.f32 %v285_v63, 0.0  ;;  %v2830_v63 = vand.u32 4294901760, %v1240_v42 }
  0xad   :  { %v595_v32 = vand.u32 4294901760, %v524_v0 }
  0xaf   :  { %v596_v45 = vsub.f32 %v524_v0, %v595_v32  ;;  %701 = vmatmul.f32.vlgmr.msrb.gmra.mxu1 %v595_v32 }
  0xb0   :  { %1198 = vmatpush.msrb.mxu1 %v2359_v30 }
  0xb1   :  { %v597_v16 = vand.u32 4294901760, %v596_v45  ;;  %755 = vmatmul.f32.vlgmr.msrb.gmra.mxu2 %v596_v45 }
  0xb2   :  { %v317_v25 = vpop.f32.mrf.mxu2  ;;  %1200 = vmatpush.msrb.mxu1 %v2379_v14  ;;  %1043 = vmatpush.msrb.mxu2 %v2390_v60 }
  0xb3   :  { %v598_v35 = vsub.f32 %v596_v45, %v597_v16  ;;  %v318_v49 = vadd.f32 %v317_v25, %v43_v37  ;;  %794 = vmatmul.f32.vlgmr.msrb.gmra.mxu3 %v597_v16  ;;  %v2846_v16 = vsub.f32 %v1240_v42, %v2830_v63 }
  0xb4   :  { %1094 = vmatpush.msrb.mxu3 %v2359_v30  ;;  %1202 = vmatpush.msrb.mxu1 %v2397_v4 }
  0xb5   :  { %v378_v22 = vpop.f32.mrf.mxu3  ;;  %v599_v62 = vand.u32 4294901760, %v598_v35  ;;  %1046 = vmatpush.msrb.mxu2 %v2407_v26 }
  0xb6   :  { %v379_v61 = vadd.f32 %v378_v22, %v318_v49  ;;  %1096 = vmatpush.msrb.mxu3 %v2379_v14  ;;  %1204 = vmatpush.msrb.mxu1 %v2409_v28  ;;  %v1238_v49 = vld [vmem:[%s3120_s3 + $0x28] sm:$0xff] }
  0xb7   :  { %v416_v24 = vpop.f32.mrf.mxu0  ;;  %600 = vmatmul.f32.vlgmr.msrb.gmra.mxu0 %v599_v62  ;;  %900 = vmatmul.f32.vlgmr.msra.gmra.mxu1 %v595_v32 }
  0xb8   :  { %v417_v52 = vadd.f32 %v416_v24, %v379_v61  ;;  %1098 = vmatpush.msrb.mxu3 %v2397_v4  ;;  %1134 = vmatpush.msrb.mxu0 %v3132_v55  ;;  %v1338_v61 = vand.u32 4294901760, %v2846_v16  ;;  %v1237_v55 = vld [vmem:[%s3120_s3 + $0x20] sm:$0xff] }
  0xb9   :  { %v447_v30 = vpop.f32.mrf.mxu1  ;;  %1206 = vmatpush.msrb.mxu1 %v2510_v21  ;;  %1049 = vmatpush.msrb.mxu2 %v2420_v36 }
  0xba   :  { %v448_v23 = vadd.f32 %v447_v30, %v417_v52  ;;  %1100 = vmatpush.msrb.mxu3 %v2409_v28  ;;  %1138 = vmatpush.msrb.mxu0 %v953_v15  ;;  %v2864_v52 = vand.u32 4294901760, %v1238_v49 }
  0xbb   :  { %v492_v14 = vpop.f32.mrf.mxu2  ;;  %1208 = vmatpush.msrb.mxu1 %v2521_v41  ;;  %1052 = vmatpush.msrb.mxu2 %v2430_v44 }
  0xbc   :  { %v493_v4 = vadd.f32 %v492_v14, %v448_v23  ;;  %1102 = vmatpush.msrb.mxu3 %v2510_v21  ;;  %1142 = vmatpush.msrb.mxu0 %v959_v17  ;;  %v1339_v23 = vsub.f32 %v2846_v16, %v1338_v61 }
  0xbd   :  { %1210 = vmatpush.msrb.mxu1 %v2534_v57  ;;  %1055 = vmatpush.msrb.mxu2 %v2519_v34  ;;  %v1247_v34 = vld [vmem:[%s3120_s3 + $0x70] sm:$0xff] }
  0xbe   :  { %v521_v60 = vpop.f32.mrf.mxu3  ;;  %1104 = vmatpush.msrb.mxu3 %v2521_v41  ;;  %1146 = vmatpush.msrb.mxu0 %v965_v54  ;;  %v2740_v41 = vand.u32 4294901760, %v1247_v34 }
  0xbf   :  { %v522_v15 = vadd.f32 %v521_v60, %v493_v4  ;;  %1212 = vmatpush.msrb.mxu1 %v2549_v8  ;;  %863 = vmatmul.f32.vlgmr.msra.gmra.mxu0 %v595_v32  ;;  %v1239_v32 = vld [vmem:[%s3120_s3 + $0x30] sm:$0xff]  ;;  %v2874_v4 = vand.u32 4294901760, %v1237_v55  ;;  %v2879_v60 = vsub.f32 %v1238_v49, %v2864_v52 }
  0xc0   :  { %1106 = vmatpush.msrb.mxu3 %v2534_v57  ;;  %1150 = vmatpush.msrb.mxu0 %v971_v50  ;;  %v1246_v50 = vld [vmem:[%s3120_s3 + $0x68] sm:$0xff]  ;;  %v2848_v25 = vand.u32 4294901760, %v1239_v32 }
  0xc1   :  { %v525_v17 = vmax.f32 %v522_v15, 0.0  ;;  %1214 = vmatpush.msrb.mxu1 %v2563_v13  ;;  %1058 = vmatpush.msrb.mxu2 %v2532_v51  ;;  %v2746_v51 = vsub.f32 %v1247_v34, %v2740_v41  ;;  %v2748_v57 = vand.u32 4294901760, %v1246_v50  ;;  %v1236_v15 = vld [vmem:[%s3120_s3 + $0x18] sm:$0xff] }
  0xc2   :  { %1108 = vmatpush.msrb.mxu3 %v2549_v8  ;;  %1154 = vmatpush.msrb.mxu0 %v977_v1  ;;  %v1245_v1 = vld [vmem:[%s3120_s3 + $0x60] sm:$0xff]  ;;  %v2861_v24 = vsub.f32 %v1239_v32, %v2848_v25 }
  0xc3   :  { %v561_v44 = vsel %vm559_vm1, %v525_v17, 0  ;;  %1216 = vmatpush.msrb.mxu1 %v2572_v53  ;;  %1061 = vmatpush.msrb.mxu2 %v2547_v6  ;;  %v1296_v6 = vand.u32 4294901760, %v2746_v51  ;;  %v2757_v8 = vsub.f32 %v1246_v50, %v2748_v57  ;;  %v1340_v17 = vand.u32 4294901760, %v1339_v23 }
  0xc4   :  { %v935_v26 = vand.u32 4294901760, %v561_v44  ;;  %1110 = vmatpush.msrb.mxu3 %v2563_v13  ;;  %1158 = vmatpush.msrb.mxu0 %v983_v33  ;;  %v2759_v33 = vand.u32 4294901760, %v1245_v1  ;;  %v1344_v14 = vand.u32 4294901760, %v2861_v24 }
  0xc5   :  { %1218 = vmatpush.msrb.mxu1 %v2587_v19  ;;  %1064 = vmatpush.msrb.mxu2 %v2560_v38  ;;  %v1244_v38 = vld [vmem:[%s3120_s3 + $0x58] sm:$0xff]  ;;  %v1297_v13 = vsub.f32 %v2746_v51, %v1296_v6 }
  0xc6   :  { %v936_v28 = vsub.f32 %v561_v44, %v935_v26  ;;  %1036 = vmatmul.f32.vlgmr.msra.gmra.mxu3 %v935_v26  ;;  %1162 = vmatpush.msrb.mxu0 %v989_v47  ;;  %v1302_v47 = vand.u32 4294901760, %v2757_v8  ;;  %v1345_v44 = vsub.f32 %v2861_v24, %v1344_v14 }
  0xc7   :  { %1112 = vmatpush.msrb.mxu3 %v2572_v53  ;;  %1220 = vmatpush.msrb.mxu1 %v2598_v12  ;;  %v2772_v53 = vsub.f32 %v1245_v1, %v2759_v33 }
  0xc8   :  { %v937_v36 = vand.u32 4294901760, %v936_v28  ;;  %1067 = vmatpush.msrb.mxu2 %v2575_v56  ;;  %1166 = vmatpush.msrb.mxu0 %v995_v9  ;;  %v2774_v56 = vand.u32 4294901760, %v1244_v38  ;;  %v1303_v9 = vsub.f32 %v2757_v8, %v1302_v47 }
  0xc9   :  { %1114 = vmatpush.msrb.mxu3 %v2587_v19  ;;  %1222 = vmatpush.msrb.mxu1 %v2614_v3  ;;  %v1298_v19 = vand.u32 4294901760, %v1297_v13  ;;  %v1234_v13 = vld [vmem:[%s3120_s3 + $0x8] sm:$0xff] }
  0xca   :  { %1070 = vmatpush.msrb.mxu2 %v2585_v18  ;;  %1170 = vmatpush.msrb.mxu0 %v1001_v58  ;;  %v938_v54 = vsub.f32 %v936_v28, %v937_v36  ;;  %v1243_v18 = vld [vmem:[%s3120_s3 + $0x50] sm:$0xff]  ;;  %v1308_v58 = vand.u32 4294901760, %v2772_v53 }
  0xcb   :  { %1116 = vmatpush.msrb.mxu3 %v2598_v12  ;;  %1224 = vmatpush.msrb.mxu1 %v2627_v11  ;;  %v2791_v12 = vand.u32 4294901760, %v1243_v18 }
  0xcc   :  { %1073 = vmatpush.msrb.mxu2 %v2596_v2  ;;  %v939_v21 = vand.u32 4294901760, %v938_v54  ;;  %1174 = vmatpush.msrb.mxu0 %v1007_v39  ;;  %v2787_v2 = vsub.f32 %v1244_v38, %v2774_v56  ;;  %v1242_v39 = vld [vmem:[%s3120_s3 + $0x48] sm:$0xff]  ;;  %v1235_v54 = vld [vmem:[%s3120_s3 + $0x10] sm:$0xff] }
  0xcd   :  { %1118 = vmatpush.msrb.mxu3 %v2614_v3  ;;  %1226 = vmatpush.msrb.mxu1 %v2637_v48  ;;  %v1309_v3 = vsub.f32 %v2772_v53, %v1308_v58  ;;  %v2904_v1 = vand.u32 4294901760, %v1235_v54 }
  0xce   :  { %940 = vmatmul.f32.vlgmr.msra.gmra.mxu2 %v939_v21  ;;  %1228 = vmatmul.f32.vlgmr.msrb.gmra.mxu1 %v935_v26  ;;  %v1346_v21 = vand.u32 4294901760, %v1345_v44  ;;  %v1588_v44 = vld [vmem:[%s3121_s4 + $0x30] sm:$0xff] }
  0xcf   :  { %1076 = vmatpush.msrb.mxu2 %v2612_v40  ;;  %1120 = vmatpush.msrb.mxu3 %v2627_v11  ;;  %v1304_v40 = vand.u32 4294901760, %v1303_v9  ;;  %v2805_v11 = vsub.f32 %v1243_v18, %v2791_v12  ;;  %v2920_v9 = vsub.f32 %v1235_v54, %v2904_v1 }
  0xd0   :  { %1178 = vmatpush.msrb.mxu0 %v1013_v5  ;;  %1443 = vmatpush.msra.mxu1 %v2740_v41  ;;  %v1314_v5 = vand.u32 4294901760, %v2787_v2 }
  0xd1   :  { %1079 = vmatpush.msrb.mxu2 %v2625_v10  ;;  %1122 = vmatpush.msrb.mxu3 %v2637_v48  ;;  %v2801_v10 = vand.u32 4294901760, %v1242_v39  ;;  %v1310_v48 = vand.u32 4294901760, %v1309_v3  ;;  %v1233_v3 = vld [vmem:[%s3120_s3] sm:$0xff] }
  0xd2   :  { %1182 = vmatpush.msrb.mxu0 %v1019_v46  ;;  %1126 = vmatmul.f32.vlgmr.msrb.gmra.mxu3 %v937_v36  ;;  %v1241_v46 = vld [vmem:[%s3120_s3 + $0x40] sm:$0xff]  ;;  %v1350_v36 = vand.u32 4294901760, %v2879_v60 }
  0xd3   :  { %1082 = vmatpush.msrb.mxu2 %v2640_v59  ;;  %1445 = vmatpush.msra.mxu1 %v2748_v57  ;;  %v1315_v59 = vsub.f32 %v2787_v2, %v1314_v5 }
  0xd4   :  { %1186 = vmatpush.msrb.mxu0 %v1025_v31  ;;  %1299 = vmatpush.msra.mxu3 %v1298_v19  ;;  %v2818_v31 = vand.u32 4294901760, %v1241_v46  ;;  %v1351_v38 = vsub.f32 %v2879_v60, %v1350_v36 }
  0xd5   :  { %1085 = vmatpush.msrb.mxu2 %v2647_v7  ;;  %1447 = vmatpush.msra.mxu1 %v2759_v33  ;;  %v2816_v7 = vsub.f32 %v1242_v39, %v2801_v10  ;;  %v1316_v20 = vand.u32 4294901760, %v1315_v59  ;;  %v2922_v39 = vand.u32 4294901760, %v1234_v13  ;;  %v1368_v59 = vand.u32 4294901760, %v2920_v9 }
  0xd6   :  { %1088 = vmatmul.f32.vlgmr.msrb.gmra.mxu2 %v936_v28  ;;  %1190 = vmatpush.msrb.mxu0 %v1031_v43  ;;  %v1320_v43 = vand.u32 4294901760, %v2805_v11  ;;  %v2828_v29 = vsub.f32 %v1241_v46, %v2818_v31  ;;  %v2891_v28 = vand.u32 4294901760, %v1236_v15 }
  0xd7   :  { %1192 = vmatmul.f32.vlgmr.msrb.gmra.mxu0 %v935_v26  ;;  %1255 = vmatpush.msra.mxu2 %v2740_v41  ;;  %v1326_v27 = vand.u32 4294901760, %v2816_v7  ;;  %v2889_v26 = vsub.f32 %v1237_v55, %v2874_v4  ;;  %v1373_v42 = vsub.f32 %v1234_v13, %v2922_v39  ;;  %v1369_v32 = vsub.f32 %v2920_v9, %v1368_v59 }
  0xd8   :  { %1392 = vmatpush.msra.mxu0 %v2746_v51  ;;  %1449 = vmatpush.msra.mxu1 %v2774_v56  ;;  %v1321_v0 = vsub.f32 %v2805_v11, %v1320_v43  ;;  %v1332_v37 = vand.u32 4294901760, %v2828_v29  ;;  %v2902_v50 = vsub.f32 %v1236_v15, %v2891_v28 }
  0xd9   :  { %1257 = vmatpush.msra.mxu2 %v2748_v57  ;;  %1305 = vmatpush.msra.mxu3 %v1304_v40  ;;  %v1327_v45 = vsub.f32 %v2816_v7, %v1326_v27  ;;  %v1356_v34 = vand.u32 4294901760, %v2889_v26  ;;  %v1352_v40 = vand.u32 4294901760, %v1351_v38  ;;  %v1370_v49 = vand.u32 4294901760, %v1369_v32  ;;  %v1585_v38 = vld [vmem:[%s3121_s4 + $0x18] sm:$0xff] }
  0xda   :  { %1395 = vmatpush.msra.mxu0 %v2757_v8  ;;  %1451 = vmatpush.msra.mxu1 %v2791_v12  ;;  %v1322_v35 = vand.u32 4294901760, %v1321_v0  ;;  %v1333_v62 = vsub.f32 %v2828_v29, %v1332_v37  ;;  %v1362_v19 = vand.u32 4294901760, %v2902_v50 }
  0xdb   :  { %1259 = vmatpush.msra.mxu2 %v2759_v33  ;;  %1311 = vmatpush.msra.mxu3 %v1310_v48  ;;  %v1328_v22 = vand.u32 4294901760, %v1327_v45  ;;  %v1357_v18 = vsub.f32 %v2889_v26, %v1356_v34  ;;  %v1374_v45 = vand.u32 4294901760, %v1373_v42 }
  0xdc   :  { %1398 = vmatpush.msra.mxu0 %v2772_v53  ;;  %1453 = vmatpush.msra.mxu1 %v2801_v10  ;;  %v1334_v30 = vand.u32 4294901760, %v1333_v62  ;;  %v1363_v48 = vsub.f32 %v2902_v50, %v1362_v19 }
  0xdd   :  { %1261 = vmatpush.msra.mxu2 %v2774_v56  ;;  %1317 = vmatpush.msra.mxu3 %v1316_v20  ;;  %v1358_v46 = vand.u32 4294901760, %v1357_v18  ;;  %v2935_v20 = vand.u32 4294901760, %v1233_v3 }
  0xde   :  { %1401 = vmatpush.msra.mxu0 %v2787_v2  ;;  %1455 = vmatpush.msra.mxu1 %v2818_v31  ;;  %v1364_v0 = vand.u32 4294901760, %v1363_v48 }
  0xdf   :  { %1263 = vmatpush.msra.mxu2 %v2791_v12  ;;  %1323 = vmatpush.msra.mxu3 %v1322_v35  ;;  %v1379_v35 = vsub.f32 %v1233_v3, %v2935_v20 }
  0xe0   :  { %1404 = vmatpush.msra.mxu0 %v2805_v11  ;;  %1457 = vmatpush.msra.mxu1 %v2830_v63 }
  0xe1   :  { %1265 = vmatpush.msra.mxu2 %v2801_v10  ;;  %1329 = vmatpush.msra.mxu3 %v1328_v22  ;;  %v1375_v22 = vsub.f32 %v1373_v42, %v1374_v45  ;;  %v1380_v62 = vand.u32 4294901760, %v1379_v35 }
  0xe2   :  { %1407 = vmatpush.msra.mxu0 %v2816_v7  ;;  %1459 = vmatpush.msra.mxu1 %v2848_v25 }
  0xe3   :  { %1267 = vmatpush.msra.mxu2 %v2818_v31  ;;  %1335 = vmatpush.msra.mxu3 %v1334_v30  ;;  %v1376_v55 = vand.u32 4294901760, %v1375_v22  ;;  %v1381_v30 = vsub.f32 %v1379_v35, %v1380_v62 }
  0xe4   :  { %1410 = vmatpush.msra.mxu0 %v2828_v29  ;;  %1461 = vmatpush.msra.mxu1 %v2864_v52 }
  0xe5   :  { %1269 = vmatpush.msra.mxu2 %v2830_v63  ;;  %1341 = vmatpush.msra.mxu3 %v1340_v17  ;;  %v1382_v23 = vand.u32 4294901760, %v1381_v30 }
  0xe6   :  { %1413 = vmatpush.msra.mxu0 %v2846_v16  ;;  %1463 = vmatpush.msra.mxu1 %v2874_v4 }
  0xe7   :  { %1271 = vmatpush.msra.mxu2 %v2848_v25  ;;  %1347 = vmatpush.msra.mxu3 %v1346_v21  ;;  %v1586_v21 = vld [vmem:[%s3121_s4 + $0x20] sm:$0xff] }
  0xe8   :  { %1416 = vmatpush.msra.mxu0 %v2861_v24  ;;  %1465 = vmatpush.msra.mxu1 %v2891_v28 }
  0xe9   :  { %1273 = vmatpush.msra.mxu2 %v2864_v52  ;;  %1353 = vmatpush.msra.mxu3 %v1352_v40 }
  0xea   :  { %1419 = vmatpush.msra.mxu0 %v2879_v60  ;;  %1467 = vmatpush.msra.mxu1 %v2904_v1 }
  0xeb   :  { %1275 = vmatpush.msra.mxu2 %v2874_v4  ;;  %1359 = vmatpush.msra.mxu3 %v1358_v46 }
  0xec   :  { %1422 = vmatpush.msra.mxu0 %v2889_v26  ;;  %1469 = vmatpush.msra.mxu1 %v2922_v39  ;;  %v2988_v26 = vand.u32 4294901760, %v1588_v44 }
  0xed   :  { %1277 = vmatpush.msra.mxu2 %v2891_v28  ;;  %1365 = vmatpush.msra.mxu3 %v1364_v0 }
  0xee   :  { %1425 = vmatpush.msra.mxu0 %v2902_v50  ;;  %1471 = vmatpush.msra.mxu1 %v2935_v20 }
  0xef   :  { %1279 = vmatpush.msra.mxu2 %v2904_v1  ;;  %1371 = vmatpush.msra.mxu3 %v1370_v49  ;;  %v1582_v49 = vld [vmem:[%s3121_s4] sm:$0xff] }
  0xf0   :  { %1428 = vmatpush.msra.mxu0 %v2920_v9  ;;  %v3019_v9 = vand.u32 4294901760, %v1585_v38  ;;  %v3057_v30 = vand.u32 4294901760, %v1582_v49 }
  0xf1   :  { %1281 = vmatpush.msra.mxu2 %v2922_v39  ;;  %1377 = vmatpush.msra.mxu3 %v1376_v55 }
  0xf2   :  { %1431 = vmatpush.msra.mxu0 %v1373_v42  ;;  %v3030_v48 = vsub.f32 %v1585_v38, %v3019_v9  ;;  %v1583_v42 = vld [vmem:[%s3121_s4 + $0x8] sm:$0xff] }
  0xf3   :  { %1283 = vmatpush.msra.mxu2 %v2935_v20  ;;  %1383 = vmatpush.msra.mxu3 %v1382_v23 }
  0xf4   :  { %1434 = vmatpush.msra.mxu0 %v1379_v35  ;;  %v1656_v32 = vand.u32 4294901760, %v3030_v48 }
  0xf5   :  { %1483 = vmatpush.msrb.mxu2 %v1296_v6  ;;  %1547 = vmatpush.msrb.mxu3 %v2740_v41  ;;  %v1825_v41 = vld [vmem:[%s3117_s5 + $0x1] ss:$0 sm:$0xff] }
  0xf6   :  { %1605 = vmatpush.msrb.mxu0 %v2988_v26 }
  0xf7   :  { %1487 = vmatpush.msrb.mxu2 %v1302_v47  ;;  %1549 = vmatpush.msrb.mxu3 %v2748_v57 }
  0xf9   :  { %1491 = vmatpush.msrb.mxu2 %v1308_v58  ;;  %1551 = vmatpush.msrb.mxu3 %v2759_v33 }
  0xfb   :  { %1495 = vmatpush.msrb.mxu2 %v1314_v5  ;;  %1553 = vmatpush.msrb.mxu3 %v2774_v56 }
  0xfd   :  { %1499 = vmatpush.msrb.mxu2 %v1320_v43  ;;  %1555 = vmatpush.msrb.mxu3 %v2791_v12 }
  0xff   :  { %1503 = vmatpush.msrb.mxu2 %v1326_v27  ;;  %1557 = vmatpush.msrb.mxu3 %v2801_v10 }
 0x101   :  { %1507 = vmatpush.msrb.mxu2 %v1332_v37  ;;  %1559 = vmatpush.msrb.mxu3 %v2818_v31 }
 0x103   :  { %1511 = vmatpush.msrb.mxu2 %v1338_v61  ;;  %1561 = vmatpush.msrb.mxu3 %v2830_v63 }
 0x105   :  { %1515 = vmatpush.msrb.mxu2 %v1344_v14  ;;  %1563 = vmatpush.msrb.mxu3 %v2848_v25 }
 0x107   :  { %1519 = vmatpush.msrb.mxu2 %v1350_v36  ;;  %1565 = vmatpush.msrb.mxu3 %v2864_v52  ;;  %v2994_v36 = vsub.f32 %v1588_v44, %v2988_v26  ;;  %v1827_v44 = vld [vmem:[%s3117_s5 + $0x3] ss:$0 sm:$0xff] }
 0x109   :  { %1523 = vmatpush.msrb.mxu2 %v1356_v34  ;;  %1567 = vmatpush.msrb.mxu3 %v2874_v4  ;;  %v1638_v34 = vand.u32 4294901760, %v2994_v36 }
 0x10b   :  { %1527 = vmatpush.msrb.mxu2 %v1362_v19  ;;  %1569 = vmatpush.msrb.mxu3 %v2891_v28  ;;  %v1587_v28 = vld [vmem:[%s3121_s4 + $0x28] sm:$0xff]  ;;  %v1639_v13 = vsub.f32 %v2994_v36, %v1638_v34 }
 0x10c   :  { %v2996_v54 = vand.u32 4294901760, %v1587_v28 }
 0x10d   :  { %1531 = vmatpush.msrb.mxu2 %v1368_v59  ;;  %1571 = vmatpush.msrb.mxu3 %v2904_v1  ;;  %v3006_v1 = vand.u32 4294901760, %v1586_v21  ;;  %v1640_v40 = vand.u32 4294901760, %v1639_v13 }
 0x10e   :  { %v3004_v50 = vsub.f32 %v1587_v28, %v2996_v54  ;;  %1607 = vmatpush.msrb.mxu0 %v2996_v54 }
 0x10f   :  { %1535 = vmatpush.msrb.mxu2 %v1374_v45  ;;  %1573 = vmatpush.msrb.mxu3 %v2922_v39  ;;  %v3017_v19 = vsub.f32 %v1586_v21, %v3006_v1  ;;  %v1584_v39 = vld [vmem:[%s3121_s4 + $0x10] sm:$0xff]  ;;  %v3042_v45 = vand.u32 4294901760, %v1583_v42 }
 0x110   :  { %v1644_v18 = vand.u32 4294901760, %v3004_v50  ;;  %1609 = vmatpush.msrb.mxu0 %v3006_v1  ;;  %v3033_v59 = vand.u32 4294901760, %v1584_v39  ;;  %1641 = vmatpush.msrb.mxu1 %v1640_v40 }
 0x111   :  { %1539 = vmatpush.msrb.mxu2 %v1380_v62  ;;  %1575 = vmatpush.msrb.mxu3 %v2935_v20  ;;  %v1650_v46 = vand.u32 4294901760, %v3017_v19  ;;  %v1657_v62 = vsub.f32 %v3030_v48, %v1656_v32  ;;  %v3055_v55 = vsub.f32 %v1583_v42, %v3042_v45 }
 0x112   :  { %v1645_v3 = vsub.f32 %v3004_v50, %v1644_v18  ;;  %1611 = vmatpush.msrb.mxu0 %v3019_v9  ;;  %v3045_v35 = vsub.f32 %v1584_v39, %v3033_v59 }
 0x113   :  { %v1651_v0 = vsub.f32 %v3017_v19, %v1650_v46 }
 0x114   :  { %v1646_v20 = vand.u32 4294901760, %v1645_v3  ;;  %1613 = vmatpush.msrb.mxu0 %v3033_v59  ;;  %v1662_v23 = vand.u32 4294901760, %v3045_v35 }
 0x115   :  { %v1652_v22 = vand.u32 4294901760, %v1651_v0 }
 0x116   :  { %1647 = vmatpush.msrb.mxu1 %v1646_v20  ;;  %1615 = vmatpush.msrb.mxu0 %v3042_v45 }
 0x118   :  { %1653 = vmatpush.msrb.mxu1 %v1652_v22  ;;  %1617 = vmatpush.msrb.mxu0 %v3057_v30 }
 0x12c   :  { %v702_v6 = vpop.f32.mrf.mxu1 }
 0x134   :  { %v601_v51 = vpop.f32.mrf.mxu0  ;;  %v756_v33 = vpop.f32.mrf.mxu2 }
 0x135   :  { %v602_v57 = vadd.f32 %v1825_v41, %v601_v51  ;;  %v901_v12 = vpop.f32.mrf.mxu1  ;;  %v1658_v41 = vand.u32 4294901760, %v1657_v62  ;;  %v1668_v51 = vand.u32 4294901760, %v3055_v55 }
 0x136   :  { %v795_v53 = vpop.f32.mrf.mxu3 }
 0x137   :  { %v703_v8 = vadd.f32 %v702_v6, %v602_v57  ;;  %v3063_v57 = vsub.f32 %v1582_v49, %v3057_v30  ;;  %v1663_v6 = vsub.f32 %v3045_v35, %v1662_v23  ;;  %1659 = vmatpush.msrb.mxu1 %v1658_v41 }
 0x139   :  { %v757_v47 = vadd.f32 %v756_v33, %v703_v8  ;;  %v1669_v8 = vsub.f32 %v3055_v55, %v1668_v51  ;;  %v1674_v33 = vand.u32 4294901760, %v3063_v57 }
 0x13b   :  { %v796_v56 = vadd.f32 %v795_v53, %v757_v47  ;;  %v1664_v47 = vand.u32 4294901760, %v1663_v6  ;;  %v1670_v53 = vand.u32 4294901760, %v1669_v8 }
 0x13c   :  { %v864_v58 = vpop.f32.mrf.mxu0 }
 0x13d   :  { %v865_v2 = vadd.f32 %v864_v58, %v796_v56  ;;  %v1675_v56 = vsub.f32 %v3063_v57, %v1674_v33  ;;  %1665 = vmatpush.msrb.mxu1 %v1664_v47 }
 0x13f   :  { %v902_v10 = vadd.f32 %v901_v12, %v865_v2  ;;  %v1676_v58 = vand.u32 4294901760, %v1675_v56  ;;  %1671 = vmatpush.msrb.mxu1 %v1670_v53  ;;  %v1826_v2 = vld [vmem:[%s3117_s5 + $0x2] ss:$0 sm:$0xff] }
 0x141   :  { %1677 = vmatpush.msrb.mxu1 %v1676_v58 }
 0x149   :  { %v1037_v11 = vpop.f32.mrf.mxu3 }
 0x14b   :  { %v1229_v25 = vpop.f32.mrf.mxu1 }
 0x151   :  { %v941_v5 = vpop.f32.mrf.mxu2 }
 0x152   :  { %v942_v7 = vadd.f32 %v941_v5, %v902_v10 }
 0x154   :  { %v1038_v31 = vadd.f32 %v1037_v11, %v942_v7  ;;  %v1193_v37 = vpop.f32.mrf.mxu0 }
 0x155   :  { %v1127_v29 = vpop.f32.mrf.mxu3 }
 0x159   :  { %v1089_v43 = vpop.f32.mrf.mxu2 }
 0x15a   :  { %v1090_v27 = vadd.f32 %v1089_v43, %v1038_v31 }
 0x15c   :  { %v1128_v63 = vadd.f32 %v1127_v29, %v1090_v27 }
 0x15e   :  { %v1194_v16 = vadd.f32 %v1193_v37, %v1128_v63 }
 0x160   :  { %v1230_v61 = vadd.f32 %v1229_v25, %v1194_v16 }
 0x162   :  { %v1232_v24 = vmax.f32 %v1230_v61, 0.0 }
 0x164   :  { %v1251_v52 = vsel %vm559_vm1, %v1232_v24, 0 }
 0x165   :  { %v1284_v14 = vand.u32 4294901760, %v1251_v52 }
 0x167   :  { %1385 = vmatmul.f32.vlgmr.msra.gmra.mxu3 %v1284_v14  ;;  %v1285_v4 = vsub.f32 %v1251_v52, %v1284_v14 }
 0x169   :  { %1437 = vmatmul.f32.vlgmr.msra.gmra.mxu0 %v1285_v4  ;;  %v1286_v60 = vand.u32 4294901760, %v1285_v4 }
 0x16a   :  { %1694 = vmatpush.msra.mxu0 %v2994_v36 }
 0x16b   :  { %1475 = vmatmul.f32.vlgmr.msra.gmra.mxu1 %v1286_v60  ;;  %v1287_v15 = vsub.f32 %v1285_v4, %v1286_v60 }
 0x16c   :  { %1697 = vmatpush.msra.mxu0 %v3004_v50  ;;  %1729 = vmatpush.msra.mxu1 %v2988_v26 }
 0x16d   :  { %v1288_v17 = vand.u32 4294901760, %v1287_v15 }
 0x16e   :  { %1700 = vmatpush.msra.mxu0 %v3017_v19  ;;  %1731 = vmatpush.msra.mxu1 %v2996_v54 }
 0x16f   :  { %1289 = vmatmul.f32.vlgmr.msra.gmra.mxu2 %v1288_v17  ;;  %1577 = vmatmul.f32.vlgmr.msrb.gmra.mxu3 %v1284_v14 }
 0x170   :  { %1703 = vmatpush.msra.mxu0 %v3030_v48  ;;  %1733 = vmatpush.msra.mxu1 %v3006_v1 }
 0x172   :  { %1706 = vmatpush.msra.mxu0 %v3045_v35  ;;  %1735 = vmatpush.msra.mxu1 %v3019_v9 }
 0x174   :  { %1709 = vmatpush.msra.mxu0 %v3055_v55  ;;  %1737 = vmatpush.msra.mxu1 %v3033_v59 }
 0x176   :  { %1712 = vmatpush.msra.mxu0 %v3063_v57  ;;  %1739 = vmatpush.msra.mxu1 %v3042_v45 }
 0x177   :  { %1541 = vmatmul.f32.vlgmr.msrb.gmra.mxu2 %v1284_v14 }
 0x178   :  { %1741 = vmatpush.msra.mxu1 %v3057_v30 }
 0x1e6   :  { %v1438_v7 = vpop.f32.mrf.mxu0 }
 0x1e8   :  { %v1476_v43 = vpop.f32.mrf.mxu1 }
 0x1ea   :  { %v1386_v12 = vpop.f32.mrf.mxu3 }
 0x1f2   :  { %v1290_v5 = vpop.f32.mrf.mxu2  ;;  %v1578_v37 = vpop.f32.mrf.mxu3 }
 0x1f3   :  { %v1291_v10 = vadd.f32 %v1826_v2, %v1290_v5 }
 0x1f5   :  { %v1387_v11 = vadd.f32 %v1386_v12, %v1291_v10 }
 0x1f7   :  { %v1439_v31 = vadd.f32 %v1438_v7, %v1387_v11 }
 0x1f9   :  { %v1477_v27 = vadd.f32 %v1476_v43, %v1439_v31 }
 0x1fa   :  { %v1542_v29 = vpop.f32.mrf.mxu2 }
 0x1fb   :  { %v1543_v63 = vadd.f32 %v1542_v29, %v1477_v27 }
 0x1fd   :  { %v1579_v16 = vadd.f32 %v1578_v37, %v1543_v63 }
 0x1ff   :  { %v1581_v25 = vmax.f32 %v1579_v16, 0.0 }
 0x201   :  { %v1593_v61 = vsel %vm1591_vm2, %v1581_v25, 0 }
 0x202   :  { %v1618_v24 = vand.u32 4294901760, %v1593_v61 }
 0x204   :  { %v1619_v52 = vsub.f32 %v1593_v61, %v1618_v24  ;;  %1679 = vmatmul.f32.vlgmr.msrb.gmra.mxu1 %v1618_v24 }
 0x205   :  { %1801 = vmatpush.msrb.mxu1 %v2988_v26 }
 0x206   :  { %v1620_v14 = vand.u32 4294901760, %v1619_v52 }
 0x207   :  { %1803 = vmatpush.msrb.mxu1 %v2996_v54 }
 0x208   :  { %v1621_v4 = vsub.f32 %v1619_v52, %v1620_v14 }
 0x209   :  { %1805 = vmatpush.msrb.mxu1 %v3006_v1 }
 0x20a   :  { %v1622_v60 = vand.u32 4294901760, %v1621_v4 }
 0x20b   :  { %1807 = vmatpush.msrb.mxu1 %v3019_v9 }
 0x20c   :  { %1623 = vmatmul.f32.vlgmr.msrb.gmra.mxu0 %v1622_v60  ;;  %1745 = vmatmul.f32.vlgmr.msra.gmra.mxu1 %v1620_v14 }
 0x20d   :  { %1761 = vmatpush.msrb.mxu0 %v1638_v34  ;;  %1809 = vmatpush.msrb.mxu1 %v3033_v59 }
 0x20f   :  { %1765 = vmatpush.msrb.mxu0 %v1644_v18  ;;  %1811 = vmatpush.msrb.mxu1 %v3042_v45 }
 0x211   :  { %1769 = vmatpush.msrb.mxu0 %v1650_v46  ;;  %1813 = vmatpush.msrb.mxu1 %v3057_v30 }
 0x213   :  { %1773 = vmatpush.msrb.mxu0 %v1656_v32 }
 0x214   :  { %1715 = vmatmul.f32.vlgmr.msra.gmra.mxu0 %v1619_v52  ;;  %1815 = vmatmul.f32.vlgmr.msrb.gmra.mxu1 %v1618_v24 }
 0x215   :  { %1777 = vmatpush.msrb.mxu0 %v1662_v23 }
 0x217   :  { %1781 = vmatpush.msrb.mxu0 %v1668_v51 }
 0x219   :  { %1785 = vmatpush.msrb.mxu0 %v1674_v33 }
 0x21c   :  { %1787 = vmatmul.f32.vlgmr.msrb.gmra.mxu0 %v1618_v24 }
 0x281   :  { %v1680_v15 = vpop.f32.mrf.mxu1 }
 0x289   :  { %v1624_v17 = vpop.f32.mrf.mxu0  ;;  %v1746_v28 = vpop.f32.mrf.mxu1 }
 0x28a   :  { %v1625_v26 = vadd.f32 %v1827_v44, %v1624_v17 }
 0x28c   :  { %v1681_v54 = vadd.f32 %v1680_v15, %v1625_v26 }
 0x291   :  { %v1716_v36 = vpop.f32.mrf.mxu0  ;;  %v1816_v38 = vpop.f32.mrf.mxu1 }
 0x292   :  { %v1717_v21 = vadd.f32 %v1716_v36, %v1681_v54 }
 0x294   :  { %v1747_v34 = vadd.f32 %v1746_v28, %v1717_v21 }
 0x299   :  { %v1788_v50 = vpop.f32.mrf.mxu0 }
 0x29a   :  { %v1789_v1 = vadd.f32 %v1788_v50, %v1747_v34 }
 0x29c   :  { %v1817_v13 = vadd.f32 %v1816_v38, %v1789_v1 }
 0x29e   :  { %1820 = vst.msk [vmem:[%s3122_s6] sm:$0x3] %vm1819_vm3, %v1817_v13 }

</bundles_post_ra>
